<compile_context>
chip_gen: v7x
topology: tpu7x:2x2x1
jax: 0.10.0
libtpu: 0.0.40
codegen_flags: <defaults>
</compile_context>

<pallas_src>
import jax
import jax.numpy as jnp
from jax import lax
from jax.experimental import pallas as pl
from jax.experimental.pallas import tpu as pltpu

# This module's default eps (the reference LayerNorm uses 1e-12, NOT
# torch.nn.LayerNorm's 1e-5).
EPS = 1e-12


def _round_up(v, m):
    return ((v + m - 1) // m) * m


def _round_down(v, m):
    return (v // m) * m


def _sublane(dtype):
    # Packed sublane count per vreg row: 8 for fp32, 16 for bf16, 32 for int8/fp8.
    return max(8, 32 // jnp.dtype(dtype).itemsize)


def _vmem_capacity_bytes():
    try:
        return int(pltpu.get_tpu_info().vmem_capacity_bytes)
    except Exception:
        return 64 * 1024 * 1024  # conservative default (v7x per-TC VMEM)


def _make_layernorm_kernel(eps):
    """Kernel closed over the static eps."""

    def kernel(x_ref, gamma_ref, beta_ref, o_ref):
        # x_ref: (block_rows, d_model); gamma/beta: (1, d_model) in float32.
        x = x_ref[...].astype(jnp.float32)
        g = gamma_ref[...]
        b = beta_ref[...]

        inv_d = jnp.float32(1.0 / x.shape[-1])
        mean = jnp.sum(x, axis=-1, keepdims=True) * inv_d
        # Two-pass variance for numerics; the centered tile is transient (only
        # feeds the reduction) instead of staying live until the store.
        c = x - mean
        var = jnp.sum(c * c, axis=-1, keepdims=True) * inv_d  # unbiased=False

        inv_std = lax.rsqrt(var + eps)        # EUP slot, effectively free
        scale = g * inv_std                   # fold gamma into the scale
        shift = b - mean * scale
        # y = (x - mean) * gamma * inv_std + beta  ==  x * scale + shift
        o_ref[...] = (x * scale + shift).astype(o_ref.dtype)

    return kernel


def layer_norm(x, gamma, beta, *, eps=EPS):
    orig_shape = x.shape
    d_model = orig_shape[-1]
    x2d = x.reshape(-1, d_model)
    rows = x2d.shape[0]

    dtype = x.dtype
    itemsize = jnp.dtype(dtype).itemsize
    sub = _sublane(dtype)

    vmem_cap = _vmem_capacity_bytes()
    # ~8 MiB x-tiles on 128 MiB-VMEM parts (v5e/v6e), ~4 MiB on 64 MiB (v7x).
    big_vmem = vmem_cap >= 96 * 1024 * 1024
    target_tile_bytes = (8 if big_vmem else 4) * 1024 * 1024

    row_bytes = d_model * itemsize
    total_bytes = rows * row_bytes

    if rows <= sub:
        # Block equals the full row extent (allowed even when not 8-aligned).
        br = rows
    else:
        br = max(sub, _round_down(target_tile_bytes // max(1, row_bytes), sub))
        br = min(br, _round_down(rows, sub))
        # For non-trivial inputs, prefer >= 4 grid steps: >= 2 balanced steps per
        # TensorCore on megacore parts and enough steps for input-prefetch /
        # output-writeback overlap. Skip for tiny inputs where extra steps only
        # add fixed per-step overhead.
        if total_bytes >= 2 * 1024 * 1024 and pl.cdiv(rows, br) < 4:
            br = max(sub, _round_down(pl.cdiv(rows, 4), sub))

    grid = (pl.cdiv(rows, br),)

    # VMEM budget from the real footprint: double-buffered in + out tiles plus
    # ~2 tile-sized f32 temporaries (x in f32, transient centered), with slack.
    tile_in_bytes = br * d_model * itemsize
    tile_f32_bytes = br * d_model * 4
    footprint = 4 * tile_in_bytes + 2 * tile_f32_bytes + (1 << 20)
    cap = (100 if big_vmem else 48) * 1024 * 1024
    vmem_limit = int(min(cap, max(32 * 1024 * 1024, footprint + footprint // 4)))

    # Keep parameters in float32 for the in-kernel math (no down-cast to bf16).
    gamma2d = gamma.reshape(1, d_model).astype(jnp.float32)
    beta2d = beta.reshape(1, d_model).astype(jnp.float32)

    kernel = _make_layernorm_kernel(eps)

    out = pl.pallas_call(
        kernel,
        out_shape=jax.ShapeDtypeStruct((rows, d_model), dtype),
        grid_spec=pltpu.PrefetchScalarGridSpec(
            num_scalar_prefetch=0,
            grid=grid,
            in_specs=[
                pl.BlockSpec((br, d_model), lambda i: (i, 0)),
                pl.BlockSpec((1, d_model), lambda i: (0, 0)),
                pl.BlockSpec((1, d_model), lambda i: (0, 0)),
            ],
            out_specs=pl.BlockSpec((br, d_model), lambda i: (i, 0)),
        ),
        compiler_params=pltpu.CompilerParams(
            dimension_semantics=("parallel",),
            vmem_limit_bytes=vmem_limit,
        ),
    )(x2d, gamma2d, beta2d)

    return out.reshape(orig_shape)


if __name__ == "__main__":
    batch, seq, d_model = 2, 8, 32
    key = jax.random.PRNGKey(0)
    x = jax.random.normal(key, (batch, seq, d_model), dtype=jnp.float32)

    # Deterministic params, matching nn.Parameter(torch.ones / torch.zeros).
    gamma = jnp.ones((d_model,), dtype=jnp.float32)
    beta = jnp.zeros((d_model,), dtype=jnp.float32)

    y = layer_norm(x, gamma, beta)
    jax.block_until_ready(y)

    # Reference check in plain JAX (same semantics as the PyTorch module:
    # mean / biased var over the last axis, eps inside the sqrt).
    mean = jnp.mean(x, axis=-1, keepdims=True)
    var = jnp.mean((x - mean) ** 2, axis=-1, keepdims=True)
    ref = gamma * (x - mean) / jnp.sqrt(var + EPS) + beta
    assert jnp.allclose(y, ref, atol=1e-5, rtol=1e-5), "mismatch vs reference"

    print("KERNEL_OK")
</pallas_src>

<mosaic_0001>
module attributes {stable_mosaic.version = 11 : i64} {
  func.func @kernel(%arg0: i32, %arg1: memref<16x32xf32, #tpu.memory_space<vmem>>, %arg2: memref<1x32xf32, #tpu.memory_space<vmem>>, %arg3: memref<1x32xf32, #tpu.memory_space<vmem>>, %arg4: memref<16x32xf32, #tpu.memory_space<vmem>>) attributes {dimension_semantics = [#tpu.dimension_semantics<parallel>], iteration_bounds = array<i64: 1>, scalar_prefetch = 0 : i64, scratch_operands = 0 : i64, tpu.core_type = #tpu.core_type<tc>, window_params = [{transform_indices = @transform_0, window_bounds = array<i64: 16, 32>}, {pipeline_mode = #tpu.pipeline_mode<synchronous>, transform_indices = @transform_1, window_bounds = array<i64: 1, 32>}, {pipeline_mode = #tpu.pipeline_mode<synchronous>, transform_indices = @transform_2, window_bounds = array<i64: 1, 32>}, {transform_indices = @transform_3, window_bounds = array<i64: 16, 32>}]} {
    %c0 = arith.constant 0 : index
    %c0_0 = arith.constant 0 : index
    %0 = vector.load %arg1[%c0, %c0_0] : memref<16x32xf32, #tpu.memory_space<vmem>>, vector<16x32xf32>
    %c0_1 = arith.constant 0 : index
    %c0_2 = arith.constant 0 : index
    %1 = vector.load %arg2[%c0_1, %c0_2] : memref<1x32xf32, #tpu.memory_space<vmem>>, vector<1x32xf32>
    %c0_3 = arith.constant 0 : index
    %c0_4 = arith.constant 0 : index
    %2 = vector.load %arg3[%c0_3, %c0_4] : memref<1x32xf32, #tpu.memory_space<vmem>>, vector<1x32xf32>
    %cst = arith.constant dense<0.000000e+00> : vector<16xf32>
    %3 = vector.multi_reduction <add>, %0, %cst [1] : vector<16x32xf32> to vector<16xf32>
    %4 = vector.shape_cast %3 : vector<16xf32> to vector<16x1xf32>
    %cst_5 = arith.constant 3.125000e-02 : f32
    %5 = vector.broadcast %cst_5 : f32 to vector<16x1xf32>
    %6 = arith.mulf %4, %5 : vector<16x1xf32>
    %7 = vector.broadcast %6 : vector<16x1xf32> to vector<16x32xf32>
    %8 = arith.subf %0, %7 : vector<16x32xf32>
    %9 = arith.mulf %8, %8 : vector<16x32xf32>
    %cst_6 = arith.constant dense<0.000000e+00> : vector<16xf32>
    %10 = vector.multi_reduction <add>, %9, %cst_6 [1] : vector<16x32xf32> to vector<16xf32>
    %11 = vector.shape_cast %10 : vector<16xf32> to vector<16x1xf32>
    %cst_7 = arith.constant 3.125000e-02 : f32
    %12 = vector.broadcast %cst_7 : f32 to vector<16x1xf32>
    %13 = arith.mulf %11, %12 : vector<16x1xf32>
    %cst_8 = arith.constant 9.99999996E-13 : f32
    %14 = vector.broadcast %cst_8 : f32 to vector<16x1xf32>
    %15 = arith.addf %13, %14 : vector<16x1xf32>
    %16 = math.rsqrt %15 : vector<16x1xf32>
    %17 = vector.broadcast %1 : vector<1x32xf32> to vector<16x32xf32>
    %18 = vector.broadcast %16 : vector<16x1xf32> to vector<16x32xf32>
    %19 = arith.mulf %17, %18 : vector<16x32xf32>
    %20 = vector.broadcast %6 : vector<16x1xf32> to vector<16x32xf32>
    %21 = arith.mulf %20, %19 : vector<16x32xf32>
    %22 = vector.broadcast %2 : vector<1x32xf32> to vector<16x32xf32>
    %23 = arith.subf %22, %21 : vector<16x32xf32>
    %24 = arith.mulf %0, %19 : vector<16x32xf32>
    %25 = arith.addf %24, %23 : vector<16x32xf32>
    %c0_9 = arith.constant 0 : index
    %c0_10 = arith.constant 0 : index
    %26 = vector.load %arg4[%c0_9, %c0_10] : memref<16x32xf32, #tpu.memory_space<vmem>>, vector<16x32xf32>
    tpu.vector_store %arg4[%c0_9, %c0_10], %25 {strides = array<i32>} : memref<16x32xf32, #tpu.memory_space<vmem>>, vector<16x32xf32>,
    return
  }
  func.func @transform_0(%arg0: i32) -> (i32, i32) {
    %c0_i32 = arith.constant 0 : i32
    %c0_i32_0 = arith.constant 0 : i32
    return %arg0, %c0_i32 : i32, i32
  }
  func.func @transform_1(%arg0: i32) -> (i32, i32) {
    %c0_i32 = arith.constant 0 : i32
    %c0_i32_0 = arith.constant 0 : i32
    %c0_i32_1 = arith.constant 0 : i32
    return %c0_i32, %c0_i32_0 : i32, i32
  }
  func.func @transform_2(%arg0: i32) -> (i32, i32) {
    %c0_i32 = arith.constant 0 : i32
    %c0_i32_0 = arith.constant 0 : i32
    %c0_i32_1 = arith.constant 0 : i32
    return %c0_i32, %c0_i32_0 : i32, i32
  }
  func.func @transform_3(%arg0: i32) -> (i32, i32) {
    %c0_i32 = arith.constant 0 : i32
    %c0_i32_0 = arith.constant 0 : i32
    return %arg0, %c0_i32 : i32, i32
  }
}

</mosaic_0001>

<bundles_post_ra>
// kernel: tpu_custom_call.1
= control target key start
LH: loop header
LB: loop body
LE: loop exit
PB: predicated region body
PF: predicated region fallthrough
CT: control target
= control target key end

     0   :  { %8 = vsyncpa [#allocation3], 0  ;;  %s223_s0 = inlined_call_operand.hbm [shape: f32[16,32], index: 0, kind: input, shape index: {}]   ;;  %s224_s1 = inlined_call_operand.vmem [shape: f32[1,32], index: 1, kind: input, shape index: {}]   ;;  %s225_s2 = inlined_call_operand.vmem [shape: f32[1,32], index: 2, kind: input, shape index: {}]   ;;  %s226_s3 = inlined_call_operand.hbm [shape: f32[16,32], index: 3, kind: output, shape index: {}]  }
   0x1   :  { %9 = vsyncpa [#allocation4], 0  ;;  %s157_s12 = smov [#allocation2]   ;;  %s109_s16 = scalar_lea.hbm %s223_s0, 256 }
   0x2   :  { %s15_s13 = sshll.u32 %s157_s12, 4  ;;  %p110_p0 = scmp.ne.s32.totalorder %s223_s0, %s109_s16  ;;  %s16_s13 = int_to_ptr.vmem [resolvable:$true] %s15_s13 }
   0x3   :  { %p113_p1 = scmp.lt.u32.totalorder %s109_s16, %s223_s0 }
   0x5   :  { %p115_p2 = pnand %p113_p1, %p110_p0 }
   0x7   :  { %118 = shalt.err (!%p115_p2)
}
   0x8   :  { %s119_s21 = scalar_lea.vmem %s16_s13, 256  ;;  %p124_p4 = scmp.lt.s32.totalorder %s16_s13, %s16_s13 }
   0x9   :  { %p120_p3 = scmp.ne.s32.totalorder %s16_s13, %s119_s21  ;;  %p125_p5 = scmp.lt.s32.totalorder %s119_s21, %s119_s21 }
   0xb   :  { %p126_p6 = por %p125_p5, %p124_p4 }
   0xd   :  { %p127_p7 = pnand %p126_p6, %p120_p3 }
   0xf   :  { %130 = shalt.err (!%p127_p7)
}
  0x10   :  { %s158_s22 = smov 128   ;;  %s159_s23 = smov 8  }
  0x11   :  { %21 = dma.hbm_to_vmem [thread:$0]  %s223_s0, 256, %s16_s13, [#allocation3], %s158_s22, %s158_s22, %s159_s23  }
  0x12   :  { %153 = dma.done.wait [#allocation3], 256  }
  0x13   :  { %154 = vsyncadd [#allocation3], 4294967040  ;;  %vm33_vm0 = vcmask 261120   ;;  %v29_v0 = vld [vmem:[#allocation2] sm:$0xff]  ;;  %v30_v1 = vld [vmem:[#allocation2 + $0x8] sm:$0xff]  ;;  %s160_s29 = smov [#allocation5]  }
  0x14   :  { %v34_v2 = vsel %vm33_vm0, %v29_v0, 0.0  ;;  %v37_v3 = vsel %vm33_vm0, %v30_v1, 0.0  ;;  %v99_v20 = vld [vmem:[%s224_s1] ss:$0 sm:$0xff]  ;;  %s87_s30 = sshll.u32 %s160_s29, 4  ;;  %s88_s30 = int_to_ptr.vmem [resolvable:$true] %s87_s30 }
  0x15   :  { %35 = vadd.xlane.f32.xlu0 %v34_v2  ;;  %v100_v23 = vld [vmem:[%s225_s2] ss:$0 sm:$0xff]  ;;  %s131_s1 = scalar_lea.vmem %s88_s30, 256  ;;  %p136_p9 = scmp.lt.s32.totalorder %s88_s30, %s88_s30 }
  0x16   :  { %p132_p8 = scmp.ne.s32.totalorder %s88_s30, %s131_s1  ;;  %p137_p10 = scmp.lt.s32.totalorder %s131_s1, %s131_s1 }
  0x18   :  { %p138_p11 = por %p137_p10, %p136_p9 }
  0x19   :  { %38 = vadd.xlane.f32.xlu0 %v37_v3 }
  0x1a   :  { %p139_p12 = pnand %p138_p11, %p132_p8 }
  0xa2   :  { %v36_v4 = vpop.xlane.xlu0 %35 }
  0xa3   :  { %v40_v5 = vmul.f32 0.03125, %v36_v4 }
  0xa5   :  { %v42_v6 = vsub.f32 %v29_v0, %v40_v5 }
  0xa6   :  { %v39_v7 = vpop.xlane.xlu0 %38 }
  0xa7   :  { %v41_v8 = vmul.f32 0.03125, %v39_v7  ;;  %v44_v9 = vmul.f32 %v42_v6, %v42_v6 }
  0xa9   :  { %v43_v10 = vsub.f32 %v30_v1, %v41_v8  ;;  %v46_v11 = vsel %vm33_vm0, %v44_v9, 0.0 }
  0xaa   :  { %47 = vadd.xlane.f32.xlu1 %v46_v11 }
  0xab   :  { %v45_v12 = vmul.f32 %v43_v10, %v43_v10 }
  0xad   :  { %v49_v13 = vsel %vm33_vm0, %v45_v12, 0.0 }
  0xae   :  { %50 = vadd.xlane.f32.xlu1 %v49_v13 }
 0x137   :  { %v48_v14 = vpop.xlane.xlu1 %47 }
 0x138   :  { %v52_v15 = vmul.f32 0.03125, %v48_v14 }
 0x13a   :  { %v54_v16 = vadd.f32 1e-12, %v52_v15 }
 0x13b   :  { %v51_v17 = vpop.xlane.xlu1 %50 }
 0x13c   :  { %105 = vrsqrt.f32 %v54_v16  ;;  %v53_v18 = vmul.f32 0.03125, %v51_v17 }
 0x13e   :  { %v55_v19 = vadd.f32 1e-12, %v53_v18 }
 0x140   :  { %107 = vrsqrt.f32 %v55_v19 }
 0x146   :  { %v106_v21 = vpop.eup %105 }
 0x147   :  { %v64_v22 = vmul.f32 %v106_v21, %v99_v20 }
 0x149   :  { %v66_v24 = vmul.f32 %v64_v22, %v40_v5  ;;  %v76_v28 = vmul.f32 %v64_v22, %v29_v0 }
 0x14a   :  { %v108_v25 = vpop.eup %107 }
 0x14b   :  { %v65_v26 = vmul.f32 %v108_v25, %v99_v20  ;;  %v74_v27 = vsub.f32 %v100_v23, %v66_v24 }
 0x14d   :  { %v67_v29 = vmul.f32 %v65_v26, %v41_v8  ;;  %v78_v30 = vadd.f32 %v76_v28, %v74_v27  ;;  %v77_v32 = vmul.f32 %v65_v26, %v30_v1 }
 0x14f   :  { %v75_v31 = vsub.f32 %v100_v23, %v67_v29  ;;  %80 = vst.msk [vmem:[#allocation5] sm:$0xff] %vm33_vm0, %v78_v30 }
 0x151   :  { %v79_v33 = vadd.f32 %v77_v32, %v75_v31 }
 0x153   :  { %81 = vst.msk [vmem:[#allocation5 + $0x8] sm:$0xff] %vm33_vm0, %v79_v33 }
 0x154   :  { %142 = shalt.err (!%p139_p12)
}
 0x155   :  { %s143_s5 = scalar_lea.hbm %s226_s3, 256 }
 0x156   :  { %p144_p13 = scmp.ne.s32.totalorder %s226_s3, %s143_s5  ;;  %p147_p0 = scmp.lt.u32.totalorder %s143_s5, %s226_s3 }
 0x158   :  { %p149_p1 = pnand %p147_p0, %p144_p13 }
 0x15a   :  { %152 = shalt.err (!%p149_p1)
}
 0x15b   :  { %93 = dma.vmem_to_hbm [thread:$0]  %s88_s30, 256, %s226_s3, [#allocation4], %s158_s22, %s158_s22, %s159_s23  }
 0x15c   :  { %155 = dma.done.wait [#allocation4], 256  }
 0x15d   :  { %156 = vsyncadd [#allocation4], 4294967040 }
 0x15e   :  { %97 = vsyncpa [#allocation3], 1 }
 0x15f   :  { %98 = vsyncpa [#allocation4], 1 }

</bundles_post_ra>
